<compile_context>
chip_gen: v6e
topology: v6e:2x2x1
jax: 0.10.0
libtpu: 0.0.40
codegen_flags: <defaults>
</compile_context>

<pallas_src>
import math

import jax
import jax.numpy as jnp
from jax.experimental import pallas as pl
from jax.experimental.pallas import tpu as pltpu


def nan_aug_kernel(thresh_ref, bits_ref, x_ref, o_ref):
    # thresh_ref: (1, F2) uint32, broadcasts over the tile rows.
    # mask[b, f] = P(bits < thresh) == p_nan[f]; thresh == 0 => never NaN.
    mask = bits_ref[...] < thresh_ref[...]
    o_ref[...] = jnp.where(mask, jnp.asarray(jnp.nan, dtype=o_ref.dtype), x_ref[...])


def nan_augmentation(x, p_nan_full, key, *, target_block_bytes=2 * 1024 * 1024):
    """x: (B, F) float; p_nan_full: (1, F) float (zeros past n_num_features);
    key: jax PRNG key used for the Bernoulli mask."""
    B, F = x.shape
    assert p_nan_full.shape == (1, F)

    # --- lane-dense folding: fold k batch rows into one kernel row so the
    # last dim is a multiple of 128 (avoids masked partial stores for small F).
    k = 128 // math.gcd(F, 128)
    F2 = k * F

    # --- batch tile size (in folded rows): ~target_block_bytes per buffer,
    # multiple of 8 sublanes; sized conservatively so double-buffered inputs
    # (bits + x) and output fit the 32 MiB default scoped VMEM even on v7x.
    rows_target = target_block_bytes // (F2 * x.dtype.itemsize)
    rows_target = max(8, min(2048, (rows_target // 8) * 8))

    rows_needed = pl.cdiv(B, k)  # folded rows required to hold B input rows
    if rows_needed <= rows_target:
        TB2 = rows_needed           # single block == full extent (allowed)
        B2 = rows_needed
    else:
        TB2 = rows_target
        B2 = pl.cdiv(rows_needed, TB2) * TB2

    # Pad the batch so it folds/tiles evenly; padded rows are sliced off below.
    B_pad = B2 * k
    if B_pad != B:
        x = jnp.concatenate([x, jnp.zeros((B_pad - B, F), x.dtype)], axis=0)
    x2 = x.reshape(B2, F2)

    # --- integer-space Bernoulli threshold: P(bits < thresh) ~= p.
    p = jnp.clip(p_nan_full.astype(jnp.float32), 0.0, 1.0)
    thresh = jnp.minimum(p * jnp.float32(2.0**32),
                         jnp.float32(4294967040.0)).astype(jnp.uint32)
    thresh = jnp.where(p <= 0.0, jnp.uint32(0), thresh)
    thresh2 = jnp.tile(thresh, (1, k))  # (1, F2): same per-feature p in each fold

    # Uniform 32-bit randoms for every (padded) element.
    bits2 = jax.random.bits(key, (B2, F2), dtype=jnp.uint32)

    grid = (B2 // TB2,)
    out2 = pl.pallas_call(
        nan_aug_kernel,
        out_shape=jax.ShapeDtypeStruct((B2, F2), x.dtype),
        grid=grid,
        in_specs=[
            pl.BlockSpec((1, F2), lambda i: (0, 0)),    # p threshold row (resident)
            pl.BlockSpec((TB2, F2), lambda i: (i, 0)),  # random bits
            pl.BlockSpec((TB2, F2), lambda i: (i, 0)),  # x
        ],
        out_specs=pl.BlockSpec((TB2, F2), lambda i: (i, 0)),
        compiler_params=pltpu.CompilerParams(
            dimension_semantics=("parallel",),  # independent batch tiles (2 TCs on v7x)
        ),
        # NOTE: could add input_output_aliases={2: 0} to overwrite x in place;
        # left off here because the demo still reads x after the call.
    )(thresh2, bits2, x2)

    return out2.reshape(B_pad, F)[:B]


if __name__ == "__main__":
    key = jax.random.PRNGKey(0)

    # Small tabular problem: batch=8, total features=32, of which 24 numeric.
    B, F, n_num_features = 8, 32, 24
    p_nan_value = 0.3

    kx, kmask = jax.random.split(key)
    x = jax.random.normal(kx, (B, F), dtype=jnp.float32)

    # p_nan buffer: scalar p broadcast over numeric features, zero for the
    # remaining (categorical) columns.
    p_nan = jnp.full((1, n_num_features), p_nan_value, dtype=jnp.float32)
    p_nan_full = jnp.concatenate(
        [p_nan, jnp.zeros((1, F - n_num_features), dtype=jnp.float32)], axis=1
    )

    out = nan_augmentation(x, p_nan_full, kmask)
    out = jax.block_until_ready(out)

    # Sanity checks on the forward semantics.
    nan_mask = jnp.isnan(out)
    assert out.shape == (B, F)
    # Categorical columns must never be NaN.
    assert not bool(jnp.any(nan_mask[:, n_num_features:]))
    # Some NaNs should appear in the numeric block (p=0.3 over 192 cells).
    assert bool(jnp.any(nan_mask[:, :n_num_features]))
    # Non-NaN entries must be untouched.
    assert bool(jnp.all(jnp.where(nan_mask, True, out == x)))

    print("KERNEL_OK")
</pallas_src>

<mosaic_0001>
module attributes {stable_mosaic.version = 11 : i64} {
  func.func @nan_aug_kernel(%arg0: i32, %arg1: memref<1x128xi32, #tpu.memory_space<vmem>>, %arg2: memref<2x128xi32, #tpu.memory_space<vmem>>, %arg3: memref<2x128xf32, #tpu.memory_space<vmem>>, %arg4: memref<2x128xf32, #tpu.memory_space<vmem>>) attributes {dimension_semantics = [#tpu.dimension_semantics<parallel>], iteration_bounds = array<i64: 1>, scalar_prefetch = 0 : i64, scratch_operands = 0 : i64, tpu.core_type = #tpu.core_type<tc>, window_params = [{pipeline_mode = #tpu.pipeline_mode<synchronous>, transform_indices = @transform_0, window_bounds = array<i64: 1, 128>}, {transform_indices = @transform_1, window_bounds = array<i64: 2, 128>}, {transform_indices = @transform_2, window_bounds = array<i64: 2, 128>}, {transform_indices = @transform_3, window_bounds = array<i64: 2, 128>}]} {
    %c0 = arith.constant 0 : index
    %c0_0 = arith.constant 0 : index
    %0 = vector.load %arg2[%c0, %c0_0] : memref<2x128xi32, #tpu.memory_space<vmem>>, vector<2x128xi32>
    %c0_1 = arith.constant 0 : index
    %c0_2 = arith.constant 0 : index
    %1 = vector.load %arg1[%c0_1, %c0_2] : memref<1x128xi32, #tpu.memory_space<vmem>>, vector<1x128xi32>
    %2 = vector.broadcast %1 : vector<1x128xi32> to vector<2x128xi32>
    %3 = arith.cmpi ult, %0, %2 : vector<2x128xi32>
    %c0_3 = arith.constant 0 : index
    %c0_4 = arith.constant 0 : index
    %4 = vector.load %arg3[%c0_3, %c0_4] : memref<2x128xf32, #tpu.memory_space<vmem>>, vector<2x128xf32>
    %cst = arith.constant 0x7FC00000 : f32
    %5 = vector.broadcast %cst : f32 to vector<2x128xf32>
    %6 = arith.select %3, %5, %4 : vector<2x128xi1>, vector<2x128xf32>
    %c0_5 = arith.constant 0 : index
    %c0_6 = arith.constant 0 : index
    %7 = vector.load %arg4[%c0_5, %c0_6] : memref<2x128xf32, #tpu.memory_space<vmem>>, vector<2x128xf32>
    tpu.vector_store %arg4[%c0_5, %c0_6], %6 {strides = array<i32>} : memref<2x128xf32, #tpu.memory_space<vmem>>, vector<2x128xf32>,
    return
  }
  func.func @transform_0(%arg0: i32) -> (i32, i32) {
    %c0_i32 = arith.constant 0 : i32
    %c0_i32_0 = arith.constant 0 : i32
    %c0_i32_1 = arith.constant 0 : i32
    return %c0_i32, %c0_i32_0 : i32, i32
  }
  func.func @transform_1(%arg0: i32) -> (i32, i32) {
    %c0_i32 = arith.constant 0 : i32
    %c0_i32_0 = arith.constant 0 : i32
    return %arg0, %c0_i32 : i32, i32
  }
  func.func @transform_2(%arg0: i32) -> (i32, i32) {
    %c0_i32 = arith.constant 0 : i32
    %c0_i32_0 = arith.constant 0 : i32
    return %arg0, %c0_i32 : i32, i32
  }
  func.func @transform_3(%arg0: i32) -> (i32, i32) {
    %c0_i32 = arith.constant 0 : i32
    %c0_i32_0 = arith.constant 0 : i32
    return %arg0, %c0_i32 : i32, i32
  }
}

</mosaic_0001>

<bundles_post_ra>
// kernel: tpu_custom_call.1
= control target key start
LH: loop header
LB: loop body
LE: loop exit
PB: predicated region body
PF: predicated region fallthrough
CT: control target
= control target key end

     0   :  { %8 = vsyncpa [#allocation3], 0  ;;  %s170_s0 = inlined_call_operand.hbm [shape: u32[1,128], index: 0, kind: input, shape index: {}]   ;;  %s171_s1 = inlined_call_operand.hbm [shape: u32[2,128], index: 1, kind: input, shape index: {}]   ;;  %s172_s2 = inlined_call_operand.vmem [shape: f32[2,128], index: 2, kind: input, shape index: {}]   ;;  %s173_s3 = inlined_call_operand.hbm [shape: f32[2,128], index: 3, kind: output, shape index: {}]  }
   0x1   :  { %9 = vsyncpa [#allocation6], 0 }
   0x2   :  { %10 = vsyncpa [#allocation4], 0  ;;  %s135_s12 = smov [#allocation2]   ;;  %s136_s14 = smov [#allocation5]  }
   0x3   :  { %s17_s13 = sshll.u32 %s135_s12, 4  ;;  %s27_s15 = sshll.u32 %s136_s14, 4  ;;  %s18_s13 = int_to_ptr.vmem [resolvable:$true] %s17_s13  ;;  %s28_s15 = int_to_ptr.vmem [resolvable:$true] %s27_s15 }
   0x4   :  { %s77_s16 = scalar_lea.vmem %s18_s13, 16  ;;  %s81_s17 = scalar_lea.vmem %s18_s13, 32 }
   0x5   :  { %p78_p0 = scmp.ne.s32.totalorder %s18_s13, %s77_s16  ;;  %p82_p1 = scmp.lt.s32.totalorder %s18_s13, %s18_s13 }
   0x6   :  { %p83_p2 = scmp.lt.s32.totalorder %s81_s17, %s77_s16 }
   0x8   :  { %p84_p3 = por %p83_p2, %p82_p1 }
   0xa   :  { %p85_p4 = pnand %p84_p3, %p78_p0 }
   0xc   :  { %88 = shalt.err (!%p85_p4)
}
   0xd   :  { %20 = dma.hbm_to_vmem [thread:$0]  %s170_s0, 16, %s18_s13, [#allocation3]  }
   0xe   :  { %s97_s20 = scalar_lea.vmem %s28_s15, 32  ;;  %p102_p6 = scmp.lt.s32.totalorder %s28_s15, %s28_s15 }
   0xf   :  { %p98_p5 = scmp.ne.s32.totalorder %s28_s15, %s97_s20  ;;  %p103_p7 = scmp.lt.s32.totalorder %s97_s20, %s97_s20 }
  0x11   :  { %p104_p8 = por %p103_p7, %p102_p6 }
  0x13   :  { %p105_p9 = pnand %p104_p8, %p98_p5 }
  0x15   :  { %108 = shalt.err (!%p105_p9)
}
  0x16   :  { %30 = dma.hbm_to_vmem [thread:$0]  %s171_s1, 32, %s28_s15, [#allocation6]  }
  0x17   :  { %129 = dma.done.wait [#allocation3], 16  }
  0x18   :  { %130 = vsyncadd [#allocation3], 4294967280 }
  0x19   :  { %131 = dma.done.wait [#allocation6], 32  }
  0x1a   :  { %132 = vsyncadd [#allocation6], 4294967264  ;;  %s137_s23 = smov [#allocation7]   ;;  %v39_v0 = vld [vmem:[#allocation5] sm:$0x3] }
  0x1b   :  { %s55_s24 = sshll.u32 %s137_s23, 4  ;;  %v65_v1 = vld [vmem:[#allocation2] ss:$0 sm:$0xff]  ;;  %s56_s24 = int_to_ptr.vmem [resolvable:$true] %s55_s24 }
  0x1c   :  { %v46_v2 = vld [vmem:[%s172_s2] sm:$0x3]  ;;  %vm45_vm0 = vcmp.lt.u32.totalorder %v39_v0, %v65_v1  ;;  %s109_s26 = scalar_lea.vmem %s56_s24, 32  ;;  %p114_p11 = scmp.lt.s32.totalorder %s56_s24, %s56_s24 }
  0x1d   :  { %v47_v3 = vsel %vm45_vm0, nan, %v46_v2  ;;  %p110_p10 = scmp.ne.s32.totalorder %s56_s24, %s109_s26  ;;  %p115_p12 = scmp.lt.s32.totalorder %s109_s26, %s109_s26 }
  0x1e   :  { %48 = vst [vmem:[#allocation7] sm:$0x3] %v47_v3 }
  0x1f   :  { %p116_p13 = por %p115_p12, %p114_p11 }
  0x21   :  { %p117_p0 = pnand %p116_p13, %p110_p10 }
  0x23   :  { %120 = shalt.err (!%p117_p0)
}
  0x24   :  { %58 = dma.vmem_to_hbm [thread:$0]  %s56_s24, 32, %s173_s3, [#allocation4]  }
  0x25   :  { %133 = dma.done.wait [#allocation4], 32  }
  0x26   :  { %134 = vsyncadd [#allocation4], 4294967264 }
  0x27   :  { %62 = vsyncpa [#allocation3], 1 }
  0x28   :  { %63 = vsyncpa [#allocation6], 1 }
  0x29   :  { %64 = vsyncpa [#allocation4], 1 }

</bundles_post_ra>
